<compile_context>
chip_gen: v5e
topology: v5e:2x2
jax: 0.10.0
libtpu: 0.0.40
codegen_flags: <defaults>
</compile_context>

<pallas_src>
import jax
import jax.numpy as jnp
from jax import lax
from jax.experimental import pallas as pl
from jax.experimental.pallas import tpu as pltpu

TN = 128                      # lane tile (hardware)
TM_MAX = 4096                 # rows per grid step (f32: 2 MiB / input tile)
ROWS_FOR_CORE_SPLIT = 8192    # only split across TensorCores for big inputs


def _cdiv(a, b):
    return -(-a // b)


def _detect_num_tensorcores():
    """2 TensorCores per chip on v7x-like parts, else 1 (v5e/v6e). Safe default: 1."""
    try:
        kind = (getattr(jax.devices()[0], "device_kind", "") or "").lower()
        if "v7" in kind or "tpu7" in kind:
            return 2
    except Exception:
        pass
    return 1


def _as_lane_view(x):
    """Lane-dense (rows, 128) view of the flattened array.

    No full-array copy in the common case; a zero-pad copy only happens when
    the flattened size is not a multiple of 128 (both operands of a pair get
    the same zero padding, so padded elements contribute 0 to the SSE).
    """
    flat = x.reshape(-1)
    n = flat.shape[0]
    rem = n % TN
    if rem:
        # TODO(synk): lane-level in-kernel masking would remove this copy too.
        flat = jnp.pad(flat, (0, TN - rem))
    rows = flat.shape[0] // TN
    return flat.reshape(rows, TN), rows


class _PairGeom:
    """Static tiling data for one (output, target) pair."""

    def __init__(self, rows, nc):
        self.rows = rows
        # Either one full-extent block (any row count is layout-legal when the
        # block equals the array dim) or TM_MAX-row blocks (multiple of 32 ->
        # aligned for f32/bf16/int8 sublane packing; dtype-aware by design).
        self.tm = rows if rows <= TM_MAX else TM_MAX
        self.nb = _cdiv(rows, self.tm)         # total row-blocks
        self.nbc = _cdiv(self.nb, nc)          # row-blocks per core
        self.mult8 = (self.tm % 8 == 0)
        # Accumulator rows: a single vreg (8, 128) when the block is
        # sublane-group aligned, otherwise the (small single-block) tile.
        self.acc_rows = 8 if self.mult8 else self.tm
        # Last block sticks out past `rows` -> needs in-kernel row masking.
        self.ragged = (self.nb * self.tm != rows)


def _make_fused_kernel(g1, g2, nc, nbc_grid):
    """Fused sum-of-squared-differences kernel for two (output, target) pairs."""

    def accumulate(o_ref, t_ref, acc_ref, g):
        c = pl.program_id(0)
        i = pl.program_id(1)
        bi = c * g.nbc + i                 # intended (un-clamped) block index

        def body(mask_rows):
            if g.mult8:
                ngrp = g.tm // 8
                if mask_rows:
                    base = bi * g.tm
                    rid8 = lax.broadcasted_iota(jnp.int32, (8, TN), 0)

                def grp(gi, acc):
                    r0 = gi * 8
                    if not isinstance(gi, int):
                        r0 = pl.multiple_of(r0, 8)
                    d = (o_ref[pl.ds(r0, 8), :].astype(jnp.float32)
                         - t_ref[pl.ds(r0, 8), :].astype(jnp.float32))
                    if mask_rows:
                        d = jnp.where(base + gi * 8 + rid8 < g.rows, d, 0.0)
                    return acc + d * d

                zero = jnp.zeros((8, TN), jnp.float32)
                if ngrp <= 8:
                    part = zero
                    for gi in range(ngrp):     # fully unrolled, static slices
                        part = grp(gi, part)
                else:
                    part = lax.fori_loop(0, ngrp, grp, zero, unroll=8)
                acc_ref[...] += part
            else:
                # Small single-block pair (tm == rows, not a multiple of 8).
                d = (o_ref[...].astype(jnp.float32)
                     - t_ref[...].astype(jnp.float32))
                if mask_rows:
                    rid = lax.broadcasted_iota(jnp.int32, (g.tm, TN), 0)
                    d = jnp.where(bi * g.tm + rid < g.rows, d, 0.0)
                acc_ref[...] += d * d

        # Static flags: can a (c, i) slot fall outside this pair's blocks?
        may_invalid = (nbc_grid > g.nbc) or (nc * g.nbc > g.nb)

        if not may_invalid and not g.ragged:
            body(False)                    # hot path: no masks, no predication
            return

        valid = (i < g.nbc) & (bi < g.nb) if may_invalid else None

        if g.ragged:
            is_last = bi == (g.nb - 1)     # only block that needs the row mask
            cond_full = jnp.logical_not(is_last)
            cond_mask = is_last
            if valid is not None:
                cond_full = jnp.logical_and(valid, cond_full)
                cond_mask = jnp.logical_and(valid, cond_mask)

            @pl.when(cond_full)
            def _():
                body(False)

            @pl.when(cond_mask)
            def _():
                body(True)
        else:
            @pl.when(valid)
            def _():
                body(False)

    def kernel(o1_ref, t1_ref, o2_ref, t2_ref, acc1_ref, acc2_ref):
        @pl.when(pl.program_id(1) == 0)
        def _():
            acc1_ref[...] = jnp.zeros_like(acc1_ref)
            acc2_ref[...] = jnp.zeros_like(acc2_ref)

        accumulate(o1_ref, t1_ref, acc1_ref, g1)
        accumulate(o2_ref, t2_ref, acc2_ref, g2)

    return kernel


def _fused_sse(output1, target1, output2, target2):
    """Returns (sum((o1-t1)^2), sum((o2-t2)^2)) via one fused Pallas kernel."""
    assert output1.shape == target1.shape, "MSELoss requires matching shapes"
    assert output2.shape == target2.shape, "MSELoss requires matching shapes"

    o1, rows1 = _as_lane_view(output1)
    t1, _ = _as_lane_view(target1)
    o2, rows2 = _as_lane_view(output2)
    t2, _ = _as_lane_view(target2)

    nc = _detect_num_tensorcores()
    # Only use the 2-way core split when both pairs are sublane-aligned and the
    # work is large enough for it to pay off (v5e/v6e always take nc=1).
    if nc == 2 and not (rows1 % 8 == 0 and rows2 % 8 == 0
                        and max(rows1, rows2) >= ROWS_FOR_CORE_SPLIT):
        nc = 1

    g1 = _PairGeom(rows1, nc)
    g2 = _PairGeom(rows2, nc)
    nbc_grid = max(g1.nbc, g2.nbc)

    def in_map(g):
        nbc, nb = g.nbc, g.nb

        def f(c, i):
            # Clamp so the auto-generated DMA always stays in bounds; blocks
            # mapped out of range are skipped (pl.when) inside the kernel.
            return (jnp.minimum(c * nbc + i, nb - 1), 0)

        return f

    def out_map(c, i):
        return (c, 0)          # per-core resident accumulator block

    # VMEM budget: 2 pipeline buffers per input tile + tiny accumulators.
    need = 0
    for g, a, b in ((g1, o1, t1), (g2, o2, t2)):
        need += 2 * g.tm * TN * (a.dtype.itemsize + b.dtype.itemsize)
        need += 2 * g.acc_rows * TN * 4
    vmem_limit = int(min(max(need + (4 << 20), 32 << 20), 64 << 20))

    acc1, acc2 = pl.pallas_call(
        _make_fused_kernel(g1, g2, nc, nbc_grid),
        out_shape=(
            jax.ShapeDtypeStruct((nc * g1.acc_rows, TN), jnp.float32),
            jax.ShapeDtypeStruct((nc * g2.acc_rows, TN), jnp.float32),
        ),
        grid_spec=pltpu.PrefetchScalarGridSpec(
            num_scalar_prefetch=0,
            grid=(nc, nbc_grid),
            in_specs=[
                # TODO(synk): if a v7x profile shows exposed DMA at TM=4096,
                # add pipeline_mode=pl.Buffered(3) to these input specs.
                pl.BlockSpec((g1.tm, TN), in_map(g1)),
                pl.BlockSpec((g1.tm, TN), in_map(g1)),
                pl.BlockSpec((g2.tm, TN), in_map(g2)),
                pl.BlockSpec((g2.tm, TN), in_map(g2)),
            ],
            out_specs=[
                pl.BlockSpec((g1.acc_rows, TN), out_map),
                pl.BlockSpec((g2.acc_rows, TN), out_map),
            ],
        ),
        compiler_params=pltpu.CompilerParams(
            # TODO(synk): verify on v7x (xprof) that the leading axis really
            # shards across the two TensorCores; switch to pltpu.CORE_PARALLEL
            # if plain "parallel" does not change the per-core split.
            dimension_semantics=("parallel", "arbitrary"),
            vmem_limit_bytes=vmem_limit,
        ),
    )(o1, t1, o2, t2)

    # Single tiny cross-lane reduction per pair, once, outside the hot loop.
    return jnp.sum(acc1), jnp.sum(acc2)


def custom_loss(output1, target1, output2, target2):
    """JAX/Pallas equivalent of CustomLoss.forward."""
    sse1, sse2 = _fused_sse(output1, target1, output2, target2)
    mse1 = sse1 / jnp.float32(output1.size)
    mse2 = sse2 / jnp.float32(output2.size)
    total_loss = mse1 + mse2
    return total_loss, mse1, mse2


if __name__ == "__main__":
    key = jax.random.PRNGKey(0)
    k1, k2, k3, k4 = jax.random.split(key, 4)

    # Small example shapes: batch=2, channels=4, spatial=16x16 for pair 1,
    # and batch=2, seq=8, hidden=32 for pair 2.
    output1 = jax.random.normal(k1, (2, 4, 16, 16), dtype=jnp.float32)
    target1 = jax.random.normal(k2, (2, 4, 16, 16), dtype=jnp.float32)
    output2 = jax.random.normal(k3, (2, 8, 32), dtype=jnp.float32)
    target2 = jax.random.normal(k4, (2, 8, 32), dtype=jnp.float32)

    loss_fn = jax.jit(custom_loss)
    total, mse1, mse2 = loss_fn(output1, target1, output2, target2)
    jax.block_until_ready((total, mse1, mse2))

    # Cross-check against plain JAX reference.
    ref1 = jnp.mean((output1 - target1) ** 2)
    ref2 = jnp.mean((output2 - target2) ** 2)
    assert jnp.allclose(mse1, ref1, rtol=1e-5, atol=1e-6), (mse1, ref1)
    assert jnp.allclose(mse2, ref2, rtol=1e-5, atol=1e-6), (mse2, ref2)
    assert jnp.allclose(total, ref1 + ref2, rtol=1e-5, atol=1e-6), (total, ref1 + ref2)

    print("KERNEL_OK")
</pallas_src>

<mosaic_0001>
module attributes {stable_mosaic.version = 11 : i64} {
  func.func @kernel(%arg0: i32, %arg1: i32, %arg2: memref<16x128xf32, #tpu.memory_space<vmem>>, %arg3: memref<16x128xf32, #tpu.memory_space<vmem>>, %arg4: memref<4x128xf32, #tpu.memory_space<vmem>>, %arg5: memref<4x128xf32, #tpu.memory_space<vmem>>, %arg6: memref<8x128xf32, #tpu.memory_space<vmem>>, %arg7: memref<4x128xf32, #tpu.memory_space<vmem>>) attributes {dimension_semantics = [#tpu.dimension_semantics<parallel>, #tpu.dimension_semantics<arbitrary>], iteration_bounds = array<i64: 1, 1>, scalar_prefetch = 0 : i64, scratch_operands = 0 : i64, tpu.core_type = #tpu.core_type<tc>, window_params = [{transform_indices = @transform_0, window_bounds = array<i64: 16, 128>}, {transform_indices = @transform_1, window_bounds = array<i64: 16, 128>}, {transform_indices = @transform_2, window_bounds = array<i64: 4, 128>}, {transform_indices = @transform_3, window_bounds = array<i64: 4, 128>}, {transform_indices = @transform_4, window_bounds = array<i64: 8, 128>}, {transform_indices = @transform_5, window_bounds = array<i64: 4, 128>}]} {
    %c0_i32 = arith.constant 0 : i32
    %0 = arith.cmpi eq, %arg1, %c0_i32 : i32
    %1 = arith.extui %0 : i1 to i32
    %c0_i32_0 = arith.constant 0 : i32
    %2 = arith.cmpi ne, %1, %c0_i32_0 : i32
    scf.if %2 {
      %cst_19 = arith.constant 0.000000e+00 : f32
      %24 = vector.broadcast %cst_19 : f32 to vector<8x128xf32>
      %c0_20 = arith.constant 0 : index
      %c0_21 = arith.constant 0 : index
      %25 = vector.load %arg6[%c0_20, %c0_21] : memref<8x128xf32, #tpu.memory_space<vmem>>, vector<8x128xf32>
      tpu.vector_store %arg6[%c0_20, %c0_21], %24 {strides = array<i32>} : memref<8x128xf32, #tpu.memory_space<vmem>>, vector<8x128xf32>,
      %cst_22 = arith.constant 0.000000e+00 : f32
      %26 = vector.broadcast %cst_22 : f32 to vector<4x128xf32>
      %c0_23 = arith.constant 0 : index
      %c0_24 = arith.constant 0 : index
      %27 = vector.load %arg7[%c0_23, %c0_24] : memref<4x128xf32, #tpu.memory_space<vmem>>, vector<4x128xf32>
      tpu.vector_store %arg7[%c0_23, %c0_24], %26 {strides = array<i32>} : memref<4x128xf32, #tpu.memory_space<vmem>>, vector<4x128xf32>,
    } else {
    }
    %cst = arith.constant 0.000000e+00 : f32
    %3 = vector.broadcast %cst : f32 to vector<8x128xf32>
    %c0 = arith.constant 0 : index
    %c0_1 = arith.constant 0 : index
    %4 = vector.load %arg2[%c0, %c0_1] : memref<16x128xf32, #tpu.memory_space<vmem>>, vector<8x128xf32>
    %c0_2 = arith.constant 0 : index
    %c0_3 = arith.constant 0 : index
    %5 = vector.load %arg3[%c0_2, %c0_3] : memref<16x128xf32, #tpu.memory_space<vmem>>, vector<8x128xf32>
    %6 = arith.subf %4, %5 : vector<8x128xf32>
    %7 = arith.mulf %6, %6 : vector<8x128xf32>
    %8 = arith.addf %3, %7 : vector<8x128xf32>
    %c8 = arith.constant 8 : index
    %c0_4 = arith.constant 0 : index
    %9 = vector.load %arg2[%c8, %c0_4] : memref<16x128xf32, #tpu.memory_space<vmem>>, vector<8x128xf32>
    %c8_5 = arith.constant 8 : index
    %c0_6 = arith.constant 0 : index
    %10 = vector.load %arg3[%c8_5, %c0_6] : memref<16x128xf32, #tpu.memory_space<vmem>>, vector<8x128xf32>
    %11 = arith.subf %9, %10 : vector<8x128xf32>
    %12 = arith.mulf %11, %11 : vector<8x128xf32>
    %13 = arith.addf %8, %12 : vector<8x128xf32>
    %c0_7 = arith.constant 0 : index
    %c0_8 = arith.constant 0 : index
    %14 = vector.load %arg6[%c0_7, %c0_8] : memref<8x128xf32, #tpu.memory_space<vmem>>, vector<8x128xf32>
    %15 = arith.addf %14, %13 : vector<8x128xf32>
    %c0_9 = arith.constant 0 : index
    %c0_10 = arith.constant 0 : index
    %16 = vector.load %arg6[%c0_9, %c0_10] : memref<8x128xf32, #tpu.memory_space<vmem>>, vector<8x128xf32>
    tpu.vector_store %arg6[%c0_9, %c0_10], %15 {strides = array<i32>} : memref<8x128xf32, #tpu.memory_space<vmem>>, vector<8x128xf32>,
    %c0_11 = arith.constant 0 : index
    %c0_12 = arith.constant 0 : index
    %17 = vector.load %arg4[%c0_11, %c0_12] : memref<4x128xf32, #tpu.memory_space<vmem>>, vector<4x128xf32>
    %c0_13 = arith.constant 0 : index
    %c0_14 = arith.constant 0 : index
    %18 = vector.load %arg5[%c0_13, %c0_14] : memref<4x128xf32, #tpu.memory_space<vmem>>, vector<4x128xf32>
    %19 = arith.subf %17, %18 : vector<4x128xf32>
    %c0_15 = arith.constant 0 : index
    %c0_16 = arith.constant 0 : index
    %20 = vector.load %arg7[%c0_15, %c0_16] : memref<4x128xf32, #tpu.memory_space<vmem>>, vector<4x128xf32>
    %21 = arith.mulf %19, %19 : vector<4x128xf32>
    %22 = arith.addf %20, %21 : vector<4x128xf32>
    %c0_17 = arith.constant 0 : index
    %c0_18 = arith.constant 0 : index
    %23 = vector.load %arg7[%c0_17, %c0_18] : memref<4x128xf32, #tpu.memory_space<vmem>>, vector<4x128xf32>
    tpu.vector_store %arg7[%c0_17, %c0_18], %22 {strides = array<i32>} : memref<4x128xf32, #tpu.memory_space<vmem>>, vector<4x128xf32>,
    return
  }
  func.func @transform_0(%arg0: i32, %arg1: i32) -> (i32, i32) {
    %c1_i32 = arith.constant 1 : i32
    %0 = arith.muli %arg0, %c1_i32 : i32
    %1 = arith.addi %0, %arg1 : i32
    %c0_i32 = arith.constant 0 : i32
    %2 = arith.minsi %1, %c0_i32 : i32
    %c0_i32_0 = arith.constant 0 : i32
    %c0_i32_1 = arith.constant 0 : i32
    return %2, %c0_i32_0 : i32, i32
  }
  func.func @transform_1(%arg0: i32, %arg1: i32) -> (i32, i32) {
    %c1_i32 = arith.constant 1 : i32
    %0 = arith.muli %arg0, %c1_i32 : i32
    %1 = arith.addi %0, %arg1 : i32
    %c0_i32 = arith.constant 0 : i32
    %2 = arith.minsi %1, %c0_i32 : i32
    %c0_i32_0 = arith.constant 0 : i32
    %c0_i32_1 = arith.constant 0 : i32
    return %2, %c0_i32_0 : i32, i32
  }
  func.func @transform_2(%arg0: i32, %arg1: i32) -> (i32, i32) {
    %c1_i32 = arith.constant 1 : i32
    %0 = arith.muli %arg0, %c1_i32 : i32
    %1 = arith.addi %0, %arg1 : i32
    %c0_i32 = arith.constant 0 : i32
    %2 = arith.minsi %1, %c0_i32 : i32
    %c0_i32_0 = arith.constant 0 : i32
    %c0_i32_1 = arith.constant 0 : i32
    return %2, %c0_i32_0 : i32, i32
  }
  func.func @transform_3(%arg0: i32, %arg1: i32) -> (i32, i32) {
    %c1_i32 = arith.constant 1 : i32
    %0 = arith.muli %arg0, %c1_i32 : i32
    %1 = arith.addi %0, %arg1 : i32
    %c0_i32 = arith.constant 0 : i32
    %2 = arith.minsi %1, %c0_i32 : i32
    %c0_i32_0 = arith.constant 0 : i32
    %c0_i32_1 = arith.constant 0 : i32
    return %2, %c0_i32_0 : i32, i32
  }
  func.func @transform_4(%arg0: i32, %arg1: i32) -> (i32, i32) {
    %c0_i32 = arith.constant 0 : i32
    %c0_i32_0 = arith.constant 0 : i32
    return %arg0, %c0_i32 : i32, i32
  }
  func.func @transform_5(%arg0: i32, %arg1: i32) -> (i32, i32) {
    %c0_i32 = arith.constant 0 : i32
    %c0_i32_0 = arith.constant 0 : i32
    return %arg0, %c0_i32 : i32, i32
  }
}

</mosaic_0001>

<bundles_post_ra>
// kernel: custom_loss.1
= control target key start
LH: loop header
LB: loop body
LE: loop exit
PB: predicated region body
PF: predicated region fallthrough
CT: control target
= control target key end

     0   :  { %v196_v0 = vmov 0.0   ;;  %s257_s5 = inlined_call_operand.vmem [shape: f32[4,128], index: 5, kind: output, shape index: {1}]   ;;  %s258_s0 = inlined_call_operand.vmem [shape: f32[16,128], index: 0, kind: input, shape index: {}]   ;;  %s259_s1 = inlined_call_operand.vmem [shape: f32[16,128], index: 1, kind: input, shape index: {}]   ;;  %s260_s2 = inlined_call_operand.vmem [shape: f32[4,128], index: 2, kind: input, shape index: {}]   ;;  %s261_s3 = inlined_call_operand.vmem [shape: f32[4,128], index: 3, kind: input, shape index: {}]   ;;  %s262_s4 = inlined_call_operand.vmem [shape: f32[8,128], index: 4, kind: output, shape index: {0}]  }
   0x1   :  { %142 = vst [vmem:[%s257_s5] sm:$0xf] %v196_v0  ;;  %v143_v1 = vld [vmem:[%s258_s0] sm:$0xff]  ;;  %v148_v3 = vld [vmem:[%s258_s0 + $0x8] sm:$0xff] }
   0x2   :  { %v144_v2 = vld [vmem:[%s259_s1] sm:$0xff]  ;;  %v149_v5 = vld [vmem:[%s259_s1 + $0x8] sm:$0xff] }
   0x3   :  { %v145_v4 = vsub.f32 %v143_v1, %v144_v2  ;;  %v156_v6 = vld [vmem:[%s260_s2] sm:$0xf]  ;;  %v150_v8 = vsub.f32 %v148_v3, %v149_v5 }
   0x4   :  { %v157_v7 = vld [vmem:[%s261_s3] sm:$0xf] }
   0x5   :  { %v158_v9 = vsub.f32 %v156_v6, %v157_v7  ;;  %v146_v10 = vmul.f32 %v145_v4, %v145_v4  ;;  %v151_v11 = vmul.f32 %v150_v8, %v150_v8 }
   0x7   :  { %v160_v12 = vmul.f32 %v158_v9, %v158_v9  ;;  %v152_v13 = vadd.f32 %v151_v11, %v146_v10 }
   0x8   :  { %v159_v14 = vld [vmem:[%s257_s5] sm:$0xf] }
   0x9   :  { %v161_v15 = vadd.f32 %v160_v12, %v159_v14  ;;  %155 = vst [vmem:[%s262_s4] sm:$0xff] %v152_v13 }
   0xb   :  { %162 = vst [vmem:[%s257_s5] sm:$0xf] %v161_v15 }

</bundles_post_ra>
